<compile_context>
chip_gen: v5e
topology: v5e:2x2
jax: 0.10.0
libtpu: 0.0.40
codegen_flags: <defaults>
</compile_context>

<pallas_src>
import functools

import jax
import jax.numpy as jnp
from jax.experimental import pallas as pl
from jax.experimental.pallas import tpu as pltpu


def gat_rel_scatter_kernel(edge0_ref, me_ref, out_ref, acc_ref, *, alpha, out_f):
    # edge0_ref : [1, te]        int32  source node id per edge (-1 = padding)
    # me_ref    : [te, out+1]    f32    cols [:out] = edge_m.T, col [out] = logit s
    # out_ref   : [tn1, out]     f32    output tile
    # acc_ref   : [tn1, out+1]   f32    accumulator: [h_prime | e_rowsum]
    n1_idx = pl.program_id(0)
    e_idx = pl.program_id(1)
    tn1 = acc_ref.shape[0]

    @pl.when(e_idx == 0)
    def _():
        acc_ref[...] = jnp.zeros_like(acc_ref)

    me = me_ref[...]                                  # [te, out+1]
    te = me.shape[0]

    s = me[:, out_f:out_f + 1]                        # [te, 1] attention logit
    lrelu = jnp.where(s > 0.0, s, alpha * s)          # LeakyReLU(alpha)
    edge_e = jnp.exp(-lrelu)                          # [te, 1]
    # TODO(synk): nn.Dropout on edge_e is identity in eval mode; training-time
    # dropout is not implemented here.

    # Build [edge_w | edge_e] in one shot: reuse `me` with its logit column
    # replaced by 1.0, then a single broadcast multiply by edge_e.  This feeds
    # ONE fused scatter matmul that yields both h_prime and e_rowsum.
    col = jax.lax.broadcasted_iota(jnp.int32, me.shape, 1)
    edge_we = edge_e * jnp.where(col == out_f, 1.0, me)        # [te, out+1]

    # One-hot scatter block for this (N1-tile, E-tile):
    #   onehot[r, e] = (edge0[e] == n1_idx*tn1 + r)
    # Offsetting the [1, te] ids is cheaper than offsetting the [tn1, te] iota.
    local_ids = edge0_ref[...] - n1_idx * tn1                  # [1, te]
    row_iota = jax.lax.broadcasted_iota(jnp.int32, (tn1, te), 0)
    onehot = (row_iota == local_ids).astype(jnp.float32)       # [tn1, te]

    acc_ref[...] += jnp.dot(onehot, edge_we,
                            preferred_element_type=jnp.float32)

    @pl.when(e_idx == pl.num_programs(1) - 1)
    def _():
        acc = acc_ref[...]
        h_prime = acc[:, :out_f]                               # [tn1, out]
        rowsum = acc[:, out_f:out_f + 1]                       # [tn1, 1]
        rowsum = jnp.where(rowsum == 0.0, 1e-12, rowsum)
        inv = pl.reciprocal(rowsum, approx=True)               # EUP slot
        inv = inv * (2.0 - rowsum * inv)                       # Newton step -> ~f32 exact
        out_ref[...] = (h_prime * inv).astype(out_ref.dtype)


def _round_up(x, m):
    return ((x + m - 1) // m) * m


def sp_graph_attention_rel(input_x, edge, edge_embed, a, a_2, alpha,
                           *, tn1=256, te=2048):
    """JAX/Pallas equivalent of SpGraphAttentionLayer_rel.forward (eval mode)."""
    n1, in_f = input_x.shape
    e_cnt = edge.shape[1]
    out_f = a.shape[0]

    input_x = input_x.astype(jnp.float32)
    edge_embed = edge_embed.astype(jnp.float32)
    a = a.astype(jnp.float32)
    a_2 = a_2.astype(jnp.float32)
    edge0 = edge[0, :].astype(jnp.int32)

    # --- Split-matmul prep (no edge_h materialization) + fused a_2 GEMV -------
    a_left_t = a[:, :in_f].T                                   # [in,  out]
    a_right_t = a[:, in_f:].T                                  # [out, out]
    a2_t = a_2.T                                               # [out, 1]

    p = input_x @ a_left_t                                     # [N1, out]
    p_aug = jnp.concatenate([p, p @ a2_t], axis=1)             # [N1, out+1]
    a_right_aug = jnp.concatenate([a_right_t, a_right_t @ a2_t], axis=1)  # [out, out+1]
    # me columns: [:out] = edge_m.T, [out] = a_2 @ edge_m (pre-LeakyReLU logit)
    me = p_aug[edge0, :] + edge_embed @ a_right_aug            # [E, out+1]

    # --- Tile sizing / padding (sized for v7x 64 MiB VMEM; fits v5e/v6e too) --
    te_eff = _round_up(max(128, min(te, _round_up(e_cnt, 128))), 128)
    tn1_eff = _round_up(max(8, min(tn1, _round_up(n1, 8))), 8)
    e_pad = _round_up(e_cnt, te_eff)
    n1_pad = _round_up(n1, tn1_eff)

    me_p = jnp.pad(me, ((0, e_pad - e_cnt), (0, 0)))
    # Padded edges get source index -1 -> their one-hot column is all zero.
    edge0_p = jnp.pad(edge0, (0, e_pad - e_cnt),
                      constant_values=-1).reshape(1, e_pad)

    grid = (n1_pad // tn1_eff, e_pad // te_eff)
    kernel = functools.partial(gat_rel_scatter_kernel,
                               alpha=float(alpha), out_f=out_f)

    out = pl.pallas_call(
        kernel,
        out_shape=jax.ShapeDtypeStruct((n1_pad, out_f), jnp.float32),
        grid=grid,
        in_specs=[
            pl.BlockSpec((1, te_eff), lambda i, j: (0, j)),            # edge0
            pl.BlockSpec((te_eff, out_f + 1), lambda i, j: (j, 0)),    # [edge_m.T | s]
        ],
        out_specs=pl.BlockSpec((tn1_eff, out_f), lambda i, j: (i, 0)),
        scratch_shapes=[pltpu.VMEM((tn1_eff, out_f + 1), jnp.float32)],
        compiler_params=pltpu.CompilerParams(
            dimension_semantics=("parallel", "arbitrary"),
            vmem_limit_bytes=32 * 1024 * 1024,
        ),
    )(edge0_p, me_p)
    return out[:n1, :]


def _xavier_normal(key, shape, gain):
    # torch.nn.init.xavier_normal_ for 2-D: std = gain * sqrt(2 / (fan_in + fan_out))
    fan_out, fan_in = shape
    std = gain * (2.0 / (fan_in + fan_out)) ** 0.5
    return std * jax.random.normal(key, shape, dtype=jnp.float32)


def _reference(input_x, edge, edge_embed, a, a_2, alpha):
    """Pure-JAX reference mirroring the torch forward (eval mode)."""
    n1 = input_x.shape[0]
    edge0 = edge[0, :]
    edge_h = jnp.concatenate([input_x[edge0, :], edge_embed], axis=1)  # [E, in+out]
    edge_m_t = edge_h @ a.T                                            # [E, out]
    s = edge_m_t @ a_2.T                                               # [E, 1]
    lrelu = jnp.where(s > 0, s, alpha * s)
    edge_e = jnp.exp(-lrelu)                                           # [E, 1]
    e_rowsum = jax.ops.segment_sum(edge_e, edge0, num_segments=n1)     # [N1, 1]
    e_rowsum = jnp.where(e_rowsum == 0.0, 1e-12, e_rowsum)
    edge_w = edge_e * edge_m_t
    h_prime = jax.ops.segment_sum(edge_w, edge0, num_segments=n1)      # [N1, out]
    return h_prime / e_rowsum


if __name__ == "__main__":
    key = jax.random.PRNGKey(0)
    k1, k2, k3, k4, k5, k6 = jax.random.split(key, 6)

    N1, N2, E = 24, 12, 300
    in_features, out_features = 8, 8
    alpha = 0.2  # LeakyReLU negative slope

    input_x = jax.random.normal(k1, (N1, in_features), dtype=jnp.float32)
    edge0 = jax.random.randint(k2, (E,), 0, N1, dtype=jnp.int32)
    edge1 = jax.random.randint(k3, (E,), 0, N2, dtype=jnp.int32)
    edge = jnp.stack([edge0, edge1], axis=0)                       # [2, E]
    edge_embed = jax.random.normal(k4, (E, out_features), dtype=jnp.float32)

    a = _xavier_normal(k5, (out_features, in_features + out_features), 1.414)
    a_2 = _xavier_normal(k6, (1, out_features), 1.414)

    # Small tiles so the test exercises a multi-tile grid (3 N1-tiles x 3 E-tiles).
    out = sp_graph_attention_rel(input_x, edge, edge_embed, a, a_2, alpha,
                                 tn1=8, te=128)
    out = jax.block_until_ready(out)

    ref = _reference(input_x, edge, edge_embed, a, a_2, alpha)
    assert out.shape == (N1, out_features)
    err = float(jnp.max(jnp.abs(out - ref)))
    assert jnp.allclose(out, ref, atol=1e-3, rtol=1e-3), err

    print("KERNEL_OK")
</pallas_src>

<mosaic_0001>
module attributes {stable_mosaic.version = 11 : i64} {
  func.func @gat_rel_scatter_kernel(%arg0: i32, %arg1: i32, %arg2: memref<1x128xi32, #tpu.memory_space<vmem>>, %arg3: memref<128x9xf32, #tpu.memory_space<vmem>>, %arg4: memref<8x8xf32, #tpu.memory_space<vmem>>, %arg5: memref<8x9xf32, #tpu.memory_space<vmem>>) attributes {dimension_semantics = [#tpu.dimension_semantics<parallel>, #tpu.dimension_semantics<arbitrary>], iteration_bounds = array<i64: 3, 3>, scalar_prefetch = 0 : i64, scratch_operands = 1 : i64, tpu.core_type = #tpu.core_type<tc>, window_params = [{transform_indices = @transform_0, window_bounds = array<i64: 1, 128>}, {transform_indices = @transform_1, window_bounds = array<i64: 128, 9>}, {transform_indices = @transform_2, window_bounds = array<i64: 8, 8>}]} {
    %c0_i32 = arith.constant 0 : i32
    %0 = arith.cmpi eq, %arg1, %c0_i32 : i32
    %1 = arith.extui %0 : i1 to i32
    %c0_i32_0 = arith.constant 0 : i32
    %2 = arith.cmpi ne, %1, %c0_i32_0 : i32
    scf.if %2 {
      %cst_14 = arith.constant 0.000000e+00 : f32
      %36 = vector.broadcast %cst_14 : f32 to vector<8x9xf32>
      %c0_15 = arith.constant 0 : index
      %c0_16 = arith.constant 0 : index
      %37 = vector.load %arg5[%c0_15, %c0_16] : memref<8x9xf32, #tpu.memory_space<vmem>>, vector<8x9xf32>
      tpu.vector_store %arg5[%c0_15, %c0_16], %36 {strides = array<i32>} : memref<8x9xf32, #tpu.memory_space<vmem>>, vector<8x9xf32>,
    } else {
    }
    %c0 = arith.constant 0 : index
    %c0_1 = arith.constant 0 : index
    %3 = vector.load %arg3[%c0, %c0_1] : memref<128x9xf32, #tpu.memory_space<vmem>>, vector<128x9xf32>
    %4 = vector.extract_strided_slice %3 {offsets = [0, 8], sizes = [128, 1], strides = [1, 1]} : vector<128x9xf32> to vector<128x1xf32>
    %cst = arith.constant 0.000000e+00 : f32
    %5 = vector.broadcast %cst : f32 to vector<128x1xf32>
    %6 = arith.cmpf ogt, %4, %5 : vector<128x1xf32>
    %cst_2 = arith.constant 2.000000e-01 : f32
    %7 = vector.broadcast %cst_2 : f32 to vector<128x1xf32>
    %8 = arith.mulf %7, %4 : vector<128x1xf32>
    %9 = arith.select %6, %4, %8 : vector<128x1xi1>, vector<128x1xf32>
    %cst_3 = arith.constant 0.000000e+00 : f32
    %10 = vector.broadcast %cst_3 : f32 to vector<128x1xf32>
    %11 = arith.subf %10, %9 : vector<128x1xf32>
    %12 = math.exp %11 : vector<128x1xf32>
    %13 = tpu.iota {dimensions = array<i32: 1>} : vector<128x9xi32>
    %c8_i32 = arith.constant 8 : i32
    %14 = vector.broadcast %c8_i32 : i32 to vector<128x9xi32>
    %15 = arith.cmpi eq, %13, %14 : vector<128x9xi32>
    %cst_4 = arith.constant 1.000000e+00 : f32
    %16 = vector.broadcast %cst_4 : f32 to vector<128x9xf32>
    %17 = arith.select %15, %16, %3 : vector<128x9xi1>, vector<128x9xf32>
    %18 = vector.broadcast %12 : vector<128x1xf32> to vector<128x9xf32>
    %19 = arith.mulf %18, %17 : vector<128x9xf32>
    %c0_5 = arith.constant 0 : index
    %c0_6 = arith.constant 0 : index
    %20 = vector.load %arg2[%c0_5, %c0_6] : memref<1x128xi32, #tpu.memory_space<vmem>>, vector<1x128xi32>
    %c8_i32_7 = arith.constant 8 : i32
    %21 = arith.muli %arg0, %c8_i32_7 : i32
    %22 = vector.broadcast %21 : i32 to vector<1x128xi32>
    %23 = arith.subi %20, %22 : vector<1x128xi32>
    %24 = tpu.iota {dimensions = array<i32: 0>} : vector<8x128xi32>
    %25 = vector.broadcast %23 : vector<1x128xi32> to vector<8x128xi32>
    %26 = arith.cmpi eq, %24, %25 : vector<8x128xi32>
    %27 = arith.extui %26 : vector<8x128xi1> to vector<8x128xi32>
    %28 = arith.sitofp %27 : vector<8x128xi32> to vector<8x128xf32>
    %c0_8 = arith.constant 0 : index
    %c0_9 = arith.constant 0 : index
    %29 = vector.load %arg5[%c0_8, %c0_9] : memref<8x9xf32, #tpu.memory_space<vmem>>, vector<8x9xf32>
    %cst_10 = arith.constant dense<0.000000e+00> : vector<8x9xf32>
    %30 = tpu.matmul %28, %19, %cst_10 {dimension_numbers = #tpu.dot_dimension_numbers<[1], [0], [0], [1], [0, 0, 1, 1], [], []>} : vector<8x128xf32>, vector<128x9xf32>, vector<8x9xf32> -> vector<8x9xf32>
    %31 = arith.addf %29, %30 : vector<8x9xf32>
    %c0_11 = arith.constant 0 : index
    %c0_12 = arith.constant 0 : index
    %32 = vector.load %arg5[%c0_11, %c0_12] : memref<8x9xf32, #tpu.memory_space<vmem>>, vector<8x9xf32>
    tpu.vector_store %arg5[%c0_11, %c0_12], %31 {strides = array<i32>} : memref<8x9xf32, #tpu.memory_space<vmem>>, vector<8x9xf32>,
    %c2_i32 = arith.constant 2 : i32
    %33 = arith.cmpi eq, %arg1, %c2_i32 : i32
    %34 = arith.extui %33 : i1 to i32
    %c0_i32_13 = arith.constant 0 : i32
    %35 = arith.cmpi ne, %34, %c0_i32_13 : i32
    scf.if %35 {
      %c0_14 = arith.constant 0 : index
      %c0_15 = arith.constant 0 : index
      %36 = vector.load %arg5[%c0_14, %c0_15] : memref<8x9xf32, #tpu.memory_space<vmem>>, vector<8x9xf32>
      %37 = vector.extract_strided_slice %36 {offsets = [0, 0], sizes = [8, 8], strides = [1, 1]} : vector<8x9xf32> to vector<8x8xf32>
      %38 = vector.extract_strided_slice %36 {offsets = [0, 8], sizes = [8, 1], strides = [1, 1]} : vector<8x9xf32> to vector<8x1xf32>
      %cst_16 = arith.constant 0.000000e+00 : f32
      %39 = vector.broadcast %cst_16 : f32 to vector<8x1xf32>
      %40 = arith.cmpf oeq, %38, %39 : vector<8x1xf32>
      %cst_17 = arith.constant 9.99999996E-13 : f32
      %41 = vector.broadcast %cst_17 : f32 to vector<8x1xf32>
      %42 = arith.select %40, %41, %38 : vector<8x1xi1>, vector<8x1xf32>
      %43 = tpu.reciprocal %42 {approx = true} : vector<8x1xf32> -> vector<8x1xf32>
      %44 = arith.mulf %42, %43 : vector<8x1xf32>
      %cst_18 = arith.constant 2.000000e+00 : f32
      %45 = vector.broadcast %cst_18 : f32 to vector<8x1xf32>
      %46 = arith.subf %45, %44 : vector<8x1xf32>
      %47 = arith.mulf %43, %46 : vector<8x1xf32>
      %48 = vector.broadcast %47 : vector<8x1xf32> to vector<8x8xf32>
      %49 = arith.mulf %37, %48 : vector<8x8xf32>
      %c0_19 = arith.constant 0 : index
      %c0_20 = arith.constant 0 : index
      %50 = vector.load %arg4[%c0_19, %c0_20] : memref<8x8xf32, #tpu.memory_space<vmem>>, vector<8x8xf32>
      tpu.vector_store %arg4[%c0_19, %c0_20], %49 {strides = array<i32>} : memref<8x8xf32, #tpu.memory_space<vmem>>, vector<8x8xf32>,
    } else {
    }
    return
  }
  func.func @transform_0(%arg0: i32, %arg1: i32) -> (i32, i32) {
    %c0_i32 = arith.constant 0 : i32
    %c0_i32_0 = arith.constant 0 : i32
    return %c0_i32, %arg1 : i32, i32
  }
  func.func @transform_1(%arg0: i32, %arg1: i32) -> (i32, i32) {
    %c0_i32 = arith.constant 0 : i32
    %c0_i32_0 = arith.constant 0 : i32
    return %arg1, %c0_i32 : i32, i32
  }
  func.func @transform_2(%arg0: i32, %arg1: i32) -> (i32, i32) {
    %c0_i32 = arith.constant 0 : i32
    %c0_i32_0 = arith.constant 0 : i32
    return %arg0, %c0_i32 : i32, i32
  }
}

</mosaic_0001>

<bundles_post_ra>
// kernel: tpu_custom_call.1
= control target key start
LH: loop header
LB: loop body
LE: loop exit
PB: predicated region body
PF: predicated region fallthrough
CT: control target
= control target key end

     0   :  { %s685_s9 = smov 0   ;;  %s687_s10 = smov 0   ;;  %s913_s0 = inlined_call_operand.vmem [shape: s32[1,384], index: 0, kind: input, shape index: {}]   ;;  %s914_s1 = inlined_call_operand.vmem [shape: f32[384,9], index: 1, kind: input, shape index: {}]   ;;  %s915_s2 = inlined_call_operand.vmem [shape: f32[24,8], index: 2, kind: output, shape index: {}]  }
   0x1   :  { %s689_s11 = smov 0   ;;  %s691_s12 = smov 0  }
   0x2   :  { %s693_s13 = smov 0  }
   0x3 LB: > { %s21_s14 = sadd.s32 1, %s656_s11  ;;  %s24_s15 = sadd.s32 1, %s660_s12  ;;  %s664_s13 = sphi %s693_s13, %s12_s13   ;;  %s660_s12 = sphi %s691_s12, %s919_s12   ;;  %s656_s11 = sphi %s689_s11, %s918_s11   ;;  %s652_s10 = sphi %s687_s10, %s917_s10   ;;  %s648_s9 = sphi %s685_s9, %s916_s9  }
   0x4   : > { %p22_p0 = scmp.ge.s32.totalorder %s21_s14, 3  ;;  %p533_p1 = scmp.ge.s32.totalorder %s664_s13, 1 }
   0x5   : > { %p133_p2 = scmp.lt.s32.totalorder %s664_s13, 10 }
   0x6   : > { %s921_s14 = smov (%p22_p0, %s21_s14), 0  ;;  %s923_s15 = smov (!%p22_p0, %s24_s15), %s660_s12 }
   0x7   : > { %p134_p3 = pnand %p533_p1, %p133_p2  ;;  %p26_p4 = scmp.ge.s32.totalorder %s923_s15, 3 }
   0x8   : > { %p157_p5 = scmp.lt.s32.totalorder (!%p134_p3), %s648_s9, 2  ;;  %s534_s16 = sshll.u32 (!%p134_p3), %s648_s9, 4 }
   0x9   : > { %s925_s15 = smov (%p26_p4, %s923_s15), 0  ;;  %137 = sbr.rel (%p134_p3) target bundleno = 466 (0x1d2), region = 28 }
   0xa   : > { %p161_p6 = scmp.lt.s32.totalorder (!%p134_p3), %s534_s16, 47  ;;  %p166_p7 = scmp.lt.s32.totalorder (!%p134_p3), %s652_s10, 2 }
   0xb   : > { %p537_p8 = scmp.ne.s32.totalorder (!%p134_p3), %s648_s9, 0 }
   0xe   : > { %s723_s17 = scalar_select %p157_p5, %s648_s9, 2 }
   0xf   : > { %s927_s16 = smov (!%p161_p6, %s534_s16), 47 }
  0x10   : > { %s159_s20 = scalar_lea.vmem %s913_s0, %s723_s17  ;;  %s535_s21 = sshll.u32 %s927_s16, 3 }
  0x11   : > { %s732_s24 = scalar_lea.vmem %s914_s1, %s535_s21  ;;  %173 = sbr.rel (%p537_p8) target bundleno = 24 (0x18), region = 32 }
  0x12   : > { %s167_s25 = scalar_select %p166_p7, %s652_s10, 2 }
  0x14   : > { %s536_s26 = sshll.u32 %s167_s25, 3 }
  0x15   : > { %s738_s29 = scalar_lea.vmem %s915_s2, %s536_s26 }
  0x16   : > { %vm174_vm0 = vcmask 72704   ;;  %v666_v0 = vmov 0.0  }
  0x17   : > { %175 = vst.msk [vmem:[#allocation2] sm:$0xff] %vm174_vm0, %v666_v0 }
  0x18 PF: > { %v742_v1 = vld [vmem:[%s732_s24 + $0x78] sm:$0xff]  ;;  %v745_v2 = vld [vmem:[%s732_s24 + $0x68] sm:$0xff]  ;;  %v667_v4 = vmov 8   ;;  %v757_v8 = vld [vmem:[%s732_s24 + $0x70] sm:$0xff]  ;;  %s538_s30 = sshll.u32 %s652_s10, 3  ;;  %p541_p9 = scmp.ne.s32.totalorder %s648_s9, 2 }
  0x19   : > { %v748_v3 = vld [vmem:[%s732_s24 + $0x58] sm:$0xff]  ;;  %590 = vset.pattern.permute.xlu2 %v667_v4  ;;  %589 = vset.pattern.permute.xlu1 %v667_v4  ;;  %vm207_vm1 = vcmp.gt.f32.partialorder %v742_v1, 0.0  ;;  %v223_v5 = vmul.f32 0.2, %v742_v1  ;;  %vm205_vm2 = vcmp.gt.f32.partialorder %v745_v2, 0.0  ;;  %v760_v9 = vld [vmem:[%s732_s24 + $0x60] sm:$0xff] }
  0x1a   : > { %v221_v6 = vmul.f32 0.2, %v745_v2  ;;  %588 = vset.pattern.permute.xlu0 %v667_v4  ;;  %vm203_vm3 = vcmp.gt.f32.partialorder %v748_v3, 0.0  ;;  %v219_v7 = vmul.f32 0.2, %v748_v3  ;;  %vm206_vm4 = vcmp.gt.f32.partialorder %v757_v8, 0.0 }
  0x1b   : > { %v239_v10 = vsel %vm207_vm1, %v742_v1, %v223_v5  ;;  %v222_v12 = vmul.f32 0.2, %v757_v8  ;;  %v767_v13 = vld [vmem:[%s732_s24 + $0x50] sm:$0xff]  ;;  %vm204_vm5 = vcmp.gt.f32.partialorder %v760_v9, 0.0  ;;  %v772_v17 = vld [vmem:[%s732_s24 + $0x48] sm:$0xff]  ;;  %v777_v21 = vld [vmem:[%s732_s24 + $0x40] sm:$0xff] }
  0x1c   : > { %v237_v11 = vsel %vm205_vm2, %v745_v2, %v221_v6  ;;  %v255_v14 = vsub.f32 0.0, %v239_v10  ;;  %v235_v16 = vsel %vm203_vm3, %v748_v3, %v219_v7  ;;  %v220_v20 = vmul.f32 0.2, %v760_v9  ;;  %v785_v30 = vld [vmem:[%s732_s24 + $0x38] sm:$0xff]  ;;  %v795_v40 = vld [vmem:[%s732_s24 + $0x30] sm:$0xff]  ;;  %v799_v42 = vld [vmem:[%s732_s24 + $0x28] sm:$0xff] }
  0x1d   : > { %v253_v15 = vsub.f32 0.0, %v237_v11  ;;  %v251_v18 = vsub.f32 0.0, %v235_v16  ;;  %v238_v19 = vsel %vm206_vm4, %v757_v8, %v222_v12  ;;  %vm202_vm6 = vcmp.gt.f32.partialorder %v767_v13, 0.0  ;;  %v802_v45 = vld [vmem:[%s732_s24 + $0x20] sm:$0xff]  ;;  %v813_v59 = vld [vmem:[%s732_s24 + $0x18] sm:$0xff]  ;;  %v817_v62 = vld [vmem:[%s732_s24 + $0x10] sm:$0xff] }
  0x1e   : > { %v286_v22 = vmul.f32 1.442695, %v255_v14  ;;  %v254_v24 = vsub.f32 0.0, %v238_v19  ;;  %v236_v26 = vsel %vm204_vm5, %v760_v9, %v220_v20  ;;  %v218_v27 = vmul.f32 0.2, %v767_v13  ;;  %v820_v4 = vld [vmem:[%s732_s24 + $0x8] sm:$0xff] }
  0x1f   : > { %v282_v23 = vmul.f32 1.442695, %v253_v15  ;;  %v278_v25 = vmul.f32 1.442695, %v251_v18  ;;  %v217_v28 = vmul.f32 0.2, %v772_v17 }
  0x20   : > { %591 = vpow2.f32 %v286_v22  ;;  %v252_v29 = vsub.f32 0.0, %v236_v26  ;;  %vm201_vm7 = vcmp.gt.f32.partialorder %v772_v17, 0.0  ;;  %v234_v31 = vsel %vm202_vm6, %v767_v13, %v218_v27  ;;  %v831_v20 = vld [vmem:[%s732_s24] sm:$0xff] }
  0x21   : > { %593 = vpow2.f32 %v282_v23  ;;  %vm200_vm8 = vcmp.gt.f32.partialorder %v777_v21, 0.0  ;;  %v216_v32 = vmul.f32 0.2, %v777_v21  ;;  %v284_v33 = vmul.f32 1.442695, %v254_v24 }
  0x22   : > { %595 = vpow2.f32 %v278_v25  ;;  %v250_v34 = vsub.f32 0.0, %v234_v31  ;;  %v280_v35 = vmul.f32 1.442695, %v252_v29  ;;  %v233_v36 = vsel %vm201_vm7, %v772_v17, %v217_v28 }
  0x23   : > { %vm199_vm9 = vcmp.gt.f32.partialorder %v785_v30, 0.0  ;;  %v215_v37 = vmul.f32 0.2, %v785_v30  ;;  %v232_v39 = vsel %vm200_vm8, %v777_v21, %v216_v32  ;;  %597 = vpow2.f32 %v284_v33 }
  0x24   : > { %v276_v38 = vmul.f32 1.442695, %v250_v34  ;;  %v249_v44 = vsub.f32 0.0, %v233_v36  ;;  %599 = vpow2.f32 %v280_v35  ;;  %v248_v47 = vsub.f32 0.0, %v232_v39 }
  0x25   : > { %v231_v41 = vsel %vm199_vm9, %v785_v30, %v215_v37  ;;  %v214_v48 = vmul.f32 0.2, %v795_v40  ;;  %vm198_vm10 = vcmp.gt.f32.partialorder %v795_v40, 0.0  ;;  %v213_v51 = vmul.f32 0.2, %v799_v42 }
  0x26   : > { %v592_v43 = vpop.eup %591  ;;  %601 = vpow2.f32 %v276_v38  ;;  %v247_v50 = vsub.f32 0.0, %v231_v41  ;;  %vm197_vm11 = vcmp.gt.f32.partialorder %v799_v42, 0.0  ;;  %v212_v52 = vmul.f32 0.2, %v802_v45 }
  0x27   : > { %v594_v46 = vpop.eup %593  ;;  %384 = vperm.xlu0 %588, %v592_v43   ;;  %v274_v53 = vmul.f32 1.442695, %v249_v44  ;;  %vm196_vm12 = vcmp.gt.f32.partialorder %v802_v45, 0.0  ;;  %v272_v54 = vmul.f32 1.442695, %v248_v47  ;;  %v230_v55 = vsel %vm198_vm10, %v795_v40, %v214_v48 }
  0x28   : > { %v596_v49 = vpop.eup %595  ;;  %374 = vperm.xlu1 %589, %v594_v46   ;;  %v270_v57 = vmul.f32 1.442695, %v247_v50  ;;  %v229_v58 = vsel %vm197_vm11, %v799_v42, %v213_v51  ;;  %v228_v61 = vsel %vm196_vm12, %v802_v45, %v212_v52  ;;  %v246_v0 = vsub.f32 0.0, %v230_v55 }
  0x29   : > { %364 = vperm.xlu2 %590, %v596_v49   ;;  %v598_v56 = vpop.eup %597  ;;  %603 = vpow2.f32 %v274_v53  ;;  %v245_v5 = vsub.f32 0.0, %v229_v58  ;;  %v211_v6 = vmul.f32 0.2, %v813_v59  ;;  %v244_v7 = vsub.f32 0.0, %v228_v61 }
  0x2a   : > { %v600_v60 = vpop.eup %599  ;;  %605 = vpow2.f32 %v272_v54  ;;  %vm195_vm13 = vcmp.gt.f32.partialorder %v813_v59, 0.0  ;;  %v210_v10 = vmul.f32 0.2, %v817_v62  ;;  %vm194_vm14 = vcmp.gt.f32.partialorder %v817_v62, 0.0 }
  0x2b   : > { %607 = vpow2.f32 %v270_v57  ;;  %v209_v11 = vmul.f32 0.2, %v820_v4  ;;  %v268_v12 = vmul.f32 1.442695, %v246_v0  ;;  %vm193_vm15 = vcmp.gt.f32.partialorder %v820_v4, 0.0 }
  0x2c   : > { %v602_v63 = vpop.eup %601  ;;  %v266_v14 = vmul.f32 1.442695, %v245_v5  ;;  %v227_v15 = vsel %vm195_vm13, %v813_v59, %v211_v6  ;;  %v264_v18 = vmul.f32 1.442695, %v244_v7  ;;  %v226_v19 = vsel %vm194_vm14, %v817_v62, %v210_v10 }
  0x2d   : > { %v225_v23 = vsel %vm193_vm15, %v820_v4, %v209_v11  ;;  %609 = vpow2.f32 %v268_v12  ;;  %v243_v25 = vsub.f32 0.0, %v227_v15  ;;  %v242_v26 = vsub.f32 0.0, %v226_v19 }
  0x2e   : > { %611 = vpow2.f32 %v266_v14  ;;  %v208_v27 = vmul.f32 0.2, %v831_v20  ;;  %v241_v28 = vsub.f32 0.0, %v225_v23  ;;  %vm192_vm0 = vcmp.gt.f32.partialorder %v831_v20, 0.0 }
  0x2f   : > { %379 = vperm.xlu0 %588, %v598_v56   ;;  %v604_v16 = vpop.eup %603  ;;  %613 = vpow2.f32 %v264_v18  ;;  %v262_v29 = vmul.f32 1.442695, %v243_v25  ;;  %v260_v31 = vmul.f32 1.442695, %v242_v26  ;;  %v288_v46 = vlaneseq }
  0x30   : > { %369 = vperm.xlu1 %589, %v600_v60   ;;  %v606_v22 = vpop.eup %605  ;;  %v224_v32 = vsel %vm192_vm0, %v831_v20, %v208_v27  ;;  %v258_v34 = vmul.f32 1.442695, %v241_v28  ;;  %v405_v23 = vstv %s538_s30  ;;  %vm435_vm3 = vcmask 72704  }
  0x31   : > { %359 = vperm.xlu2 %590, %v602_v63   ;;  %v608_v24 = vpop.eup %607  ;;  %615 = vpow2.f32 %v262_v29  ;;  %v240_v37 = vsub.f32 0.0, %v224_v32  ;;  %v838_v47 = vand.u32 127, %v288_v46  ;;  %v408_v32 = vshrl.u32 %v288_v46, 7 }
  0x32   : > { %617 = vpow2.f32 %v260_v31 }
  0x33   : > { %v610_v33 = vpop.eup %609  ;;  %619 = vpow2.f32 %v258_v34  ;;  %v256_v38 = vmul.f32 1.442695, %v240_v37  ;;  %vm290_vm1 = vcmp.eq.s32.totalorder %v838_v47, 8 }
  0x34   : > { %v612_v35 = vpop.eup %611  ;;  %v306_v49 = vsel %vm290_vm1, 1.0, %v742_v1  ;;  %v305_v54 = vsel %vm290_vm1, 1.0, %v757_v8  ;;  %v304_v55 = vsel %vm290_vm1, 1.0, %v745_v2  ;;  %v303_v1 = vsel %vm290_vm1, 1.0, %v760_v9 }
  0x35   : > { %v614_v36 = vpop.eup %613  ;;  %621 = vpow2.f32 %v256_v38  ;;  %v302_v61 = vsel %vm290_vm1, 1.0, %v748_v3  ;;  %v301_v8 = vsel %vm290_vm1, 1.0, %v767_v13  ;;  %v300_v5 = vsel %vm290_vm1, 1.0, %v772_v17 }
  0x36   : > { %v299_v3 = vsel %vm290_vm1, 1.0, %v777_v21  ;;  %v298_v13 = vsel %vm290_vm1, 1.0, %v785_v30  ;;  %v297_v17 = vsel %vm290_vm1, 1.0, %v795_v40  ;;  %v296_v21 = vsel %vm290_vm1, 1.0, %v799_v42  ;;  %v403_v42 = vld [vmem:[%s159_s20] sm:$0x1] }
  0x37   : > { %354 = vperm.xlu0 %588, %v604_v16   ;;  %v616_v39 = vpop.eup %615  ;;  %v295_v30 = vsel %vm290_vm1, 1.0, %v802_v45  ;;  %v293_v45 = vsel %vm290_vm1, 1.0, %v817_v62  ;;  %v406_v27 = vsub.s32 %v403_v42, %v405_v23  ;;  %v292_v28 = vsel %vm290_vm1, 1.0, %v820_v4  ;;  %v413_v4 = vld [vmem:[#allocation2] sm:$0xff] }
  0x38   : > { %349 = vperm.xlu1 %589, %v606_v22   ;;  %v618_v41 = vpop.eup %617  ;;  %v294_v22 = vsel %vm290_vm1, 1.0, %v813_v59  ;;  %v291_v34 = vsel %vm290_vm1, 1.0, %v831_v20 }
  0x39   : > { %344 = vperm.xlu2 %590, %v608_v24   ;;  %v620_v43 = vpop.eup %619 }
  0x3b   : > { %v622_v44 = vpop.eup %621 }
  0x3f   : > { %339 = vperm.xlu0 %588, %v610_v33   ;;  %v409_v33 = vperm.slane %v406_v27, 0 }
  0x40   : > { %334 = vperm.xlu1 %589, %v612_v35  }
  0x41   : > { %329 = vperm.xlu2 %590, %v614_v36   ;;  %vm410_vm2 = vcmp.eq.s32.totalorder %v408_v32, %v409_v33  ;;  %v668_v36 = vmov 1.0  }
  0x47   : > { %324 = vperm.xlu0 %588, %v616_v39  }
  0x48   : > { %319 = vperm.xlu1 %589, %v618_v41  }
  0x49   : > { %314 = vperm.xlu2 %590, %v620_v43  }
  0x4f   : > { %309 = vperm.xlu0 %588, %v622_v44  }
  0x83   : > { %v365_v48 = vpop.permute.xlu2 %364 }
  0x84   : > { %v398_v0 = vmul.f32 %v365_v48, %v302_v61 }
  0x8b   : > { %v360_v53 = vpop.permute.xlu2 %359 }
  0x8c   : > { %v397_v6 = vmul.f32 %v360_v53, %v301_v8 }
  0x93   : > { %v345_v2 = vpop.permute.xlu2 %344 }
  0x94   : > { %v394_v12 = vmul.f32 %v345_v2, %v298_v13 }
  0x99   : > { %v385_v50 = vpop.permute.xlu0 %384 }
  0x9a   : > { %v375_v51 = vpop.permute.xlu1 %374  ;;  %v402_v52 = vmul.f32 %v385_v50, %v306_v49 }
  0x9b   : > { %v400_v60 = vmul.f32 %v375_v51, %v304_v55  ;;  %v330_v14 = vpop.permute.xlu2 %329 }
  0x9c   : > { %414 = vmatpush.msra.mxu0 %v402_v52  ;;  %v391_v40 = vmul.f32 %v330_v14, %v295_v30 }
  0xa1   : > { %v380_v56 = vpop.permute.xlu0 %379 }
  0xa2   : > { %v401_v57 = vmul.f32 %v380_v56, %v305_v54  ;;  %v370_v58 = vpop.permute.xlu1 %369 }
  0xa3   : > { %v399_v63 = vmul.f32 %v370_v58, %v303_v1  ;;  %v315_v59 = vpop.permute.xlu2 %314 }
  0xa4   : > { %415 = vmatpush.msra.mxu0 %v401_v57  ;;  %v388_v31 = vmul.f32 %v315_v59, %v292_v28 }
  0xa6   : > { %416 = vmatpush.msra.mxu0 %v400_v60 }
  0xa8   : > { %417 = vmatpush.msra.mxu0 %v399_v63 }
  0xa9   : > { %v355_v9 = vpop.permute.xlu0 %354 }
  0xaa   : > { %v350_v7 = vpop.permute.xlu1 %349  ;;  %418 = vmatpush.msra.mxu0 %v398_v0  ;;  %v396_v10 = vmul.f32 %v355_v9, %v300_v5 }
  0xab   : > { %v395_v11 = vmul.f32 %v350_v7, %v299_v3 }
  0xac   : > { %419 = vmatpush.msra.mxu0 %v397_v6 }
  0xae   : > { %420 = vmatpush.msra.mxu0 %v396_v10 }
  0xb0   : > { %421 = vmatpush.msra.mxu0 %v395_v11 }
  0xb1   : > { %v340_v15 = vpop.permute.xlu0 %339 }
  0xb2   : > { %v393_v16 = vmul.f32 %v340_v15, %v297_v17  ;;  %v335_v18 = vpop.permute.xlu1 %334  ;;  %422 = vmatpush.msra.mxu0 %v394_v12 }
  0xb3   : > { %v392_v19 = vmul.f32 %v335_v18, %v296_v21 }
  0xb4   : > { %423 = vmatpush.msra.mxu0 %v393_v16 }
  0xb6   : > { %424 = vmatpush.msra.mxu0 %v392_v19 }
  0xb8   : > { %425 = vmatpush.msra.mxu0 %v391_v40 }
  0xb9   : > { %v325_v24 = vpop.permute.xlu0 %324 }
  0xba   : > { %v390_v25 = vmul.f32 %v325_v24, %v294_v22  ;;  %v320_v26 = vpop.permute.xlu1 %319 }
  0xbb   : > { %v389_v29 = vmul.f32 %v320_v26, %v293_v45 }
  0xbc   : > { %426 = vmatpush.msra.mxu0 %v390_v25 }
  0xbe   : > { %427 = vmatpush.msra.mxu0 %v389_v29 }
  0xc0   : > { %428 = vmatpush.msra.mxu0 %v388_v31 }
  0xc1   : > { %v310_v62 = vpop.permute.xlu0 %309 }
  0xc2   : > { %v387_v35 = vmul.f32 %v310_v62, %v291_v34 }
  0xc4   : > { %429 = vmatpush.msra.mxu0 %v387_v35 }
  0xc5   : > { %540 = vmatmul.msk.f32.vlgmr.msra.gmra.mxu0 %vm410_vm2, %v668_v36 }
 0x141   : > { %440 = sbr.rel (%p541_p9) target bundleno = 466 (0x1d2), region = 36 }
 0x142   : > { %v431_v37 = vpop.f32.mrf.mxu0 }
 0x143   : > { %v434_v38 = vadd.f32 %v431_v37, %v413_v4 }
 0x145   : > { %436 = vst.msk [vmem:[#allocation2] sm:$0xff] %vm435_vm3, %v434_v38 }
 0x146   : > { %v669_v41 = vmov 8   ;;  %vm454_vm5 = vcmask 64512  }
 0x147   : > { %623 = vset.pattern.permute.xlu0 %v669_v41 }
 0x14c   : > { %v441_v39 = vld [vmem:[#allocation2] sm:$0xff] }
 0x14d   : > { %vm442_vm4 = vcmp.eq.f32.partialorder %v441_v39, 0.0 }
 0x14e   : > { %v443_v20 = vsel %vm442_vm4, 1e-12, %v441_v39 }
 0x14f   : > { %624 = vrcp.f32 %v443_v20 }
 0x155   : > { %v625_v43 = vpop.eup %624 }
 0x156   : > { %v445_v44 = vmul.f32 %v625_v43, %v443_v20 }
 0x158   : > { %v446_v46 = vsub.f32 2.0, %v445_v44 }
 0x15a   : > { %v447_v47 = vmul.f32 %v625_v43, %v446_v46 }
 0x15c   : > { %450 = vperm.xlu0 %623, %v447_v47  }
 0x1ce   : > { %v451_v48 = vpop.permute.xlu0 %450 }
 0x1cf   : > { %v453_v49 = vmul.f32 %v451_v48, %v441_v39 }
 0x1d1   : > { %455 = vst.msk [vmem:[%s738_s29] sm:$0xff] %vm454_vm5, %v453_v49 }
 0x1d2 PF: > { %s12_s13 = sadd.s32 1, %s664_s13   ;;  %s916_s9 = smov %s656_s11 }
 0x1d3   : > { %p9_p10 = scmp.ge.s32.totalorder %s12_s13, 11   ;;  %s917_s10 = smov %s660_s12 }
 0x1d4   : > { %s918_s11 = smov %s921_s14  ;;  %s919_s12 = smov %s925_s15 }
 0x1d5   :  { %11 = sbr.rel (!%p9_p10) target bundleno = 3 (0x3), region = 69 }

</bundles_post_ra>
